<compile_context>
chip_gen: v6e
topology: v6e:2x2x1
jax: 0.10.0
libtpu: 0.0.40
codegen_flags: <defaults>
</compile_context>

<pallas_src>
import jax
import jax.numpy as jnp
from jax.experimental import pallas as pl
from jax.experimental.pallas import tpu as pltpu

BATCH = 2
EMB = 620            # each pretrained .embed() output width
CAT = 2 * EMB        # 1240 after torch.cat(..., dim=1)
ENC_OUT = 112        # flattened multi_learner output per sample
HID = 64
NCLS = 3
BN_EPS = 1e-5

# Packed small-param buffer layout (f32, shape (8 + HID + 8, 128)):
#   row 0,            cols [0:HID)  -> b1_eff  (Linear1 bias, BN1 folded)
#   rows [8, 8+HID),  cols [0:NCLS) -> w2_eff  (Linear2 weight, BN2 folded)
#   row 8+HID,        cols [0:NCLS) -> b2_eff  (Linear2 bias, BN2 folded)
SMALL_ROWS = 8 + HID + 8


def dti_head_kernel(x_nf_ref, x_up_ref, w_top_ref, w_bot_ref, small_ref, out_ref):
    # Fused head:  logits = ReLU(x_nf@W_top + x_up@W_bot + b1) @ W2 + b2
    # (encoder projection, Linear1 and both eval-mode BatchNorms are folded into
    #  W_top/W_bot/b1 and W2/b2 offline; Dropout(p=0.1) is identity at inference.)
    h1 = (jnp.dot(x_nf_ref[...], w_top_ref[...], preferred_element_type=jnp.float32)
          + jnp.dot(x_up_ref[...], w_bot_ref[...], preferred_element_type=jnp.float32)
          + small_ref[0:1, 0:HID])                                   # (B, 64)
    h1 = jnp.maximum(h1, 0.0)                                        # ReLU
    w2 = small_ref[8:8 + HID, 0:NCLS]                                # (64, 3)
    b2 = small_ref[8 + HID:9 + HID, 0:NCLS]                          # (1, 3)
    out_ref[...] = (jnp.dot(h1, w2, preferred_element_type=jnp.float32)
                    + b2).astype(out_ref.dtype)


def prepare_fused_params(p):
    """Offline (once per checkpoint) algebraic fusion; all folds done in f32."""
    # Fold BN1 into Linear(112, 64)
    s1 = p["g1"] * jax.lax.rsqrt(p["v1"] + BN_EPS)                   # (1, HID)
    w1_eff = p["w1"] * s1                                            # (112, 64)
    b1_eff = (p["b1"] - p["m1"]) * s1 + p["beta1"]                   # (1, 64)
    # Fold BN2 into Linear(64, 3)
    s2 = p["g2"] * jax.lax.rsqrt(p["v2"] + BN_EPS)                   # (1, NCLS)
    w2_eff = p["w2"] * s2                                            # (64, 3)
    b2_eff = (p["b2"] - p["m2"]) * s2 + p["beta2"]                   # (1, 3)

    # Pre-multiply the encoder projection into Linear1 (no nonlinearity between).
    w_comb = p["w_enc"] @ w1_eff                                     # (1240, 64) f32
    w_top = w_comb[:EMB].astype(jnp.bfloat16)                        # rows for x_nf
    w_bot = w_comb[EMB:].astype(jnp.bfloat16)                        # rows for x_up

    small = jnp.zeros((SMALL_ROWS, 128), jnp.float32)
    small = small.at[0, :HID].set(b1_eff[0])
    small = small.at[8:8 + HID, :NCLS].set(w2_eff)
    small = small.at[8 + HID, :NCLS].set(b2_eff[0])
    return {"w_top": w_top, "w_bot": w_bot, "small": small}


def dti_3class_forward(inter_vect_no_forgetting, inter_vect_updated, fused):
    vmem = pl.BlockSpec(memory_space=pltpu.MemorySpace.VMEM)
    return pl.pallas_call(
        dti_head_kernel,
        out_shape=jax.ShapeDtypeStruct(
            (inter_vect_no_forgetting.shape[0], NCLS), jnp.float32),
        in_specs=[vmem] * 5,
        out_specs=vmem,
    )(inter_vect_no_forgetting.astype(jnp.bfloat16),
      inter_vect_updated.astype(jnp.bfloat16),
      fused["w_top"], fused["w_bot"], fused["small"])


def init_params(key):
    ks = jax.random.split(key, 5)

    def u(k, shape, fan_in):
        bound = 1.0 / jnp.sqrt(jnp.float32(fan_in))
        return jax.random.uniform(k, shape, jnp.float32, -bound, bound)

    return {
        # stand-in encoder projection (ResnetEncoderModel surrogate)
        "w_enc": u(ks[0], (CAT, ENC_OUT), CAT),
        # Linear(112, 64)
        "w1": u(ks[1], (ENC_OUT, HID), ENC_OUT),
        "b1": u(ks[2], (1, HID), ENC_OUT),
        # BatchNorm1d(64)
        "g1": jnp.ones((1, HID), jnp.float32),
        "beta1": jnp.zeros((1, HID), jnp.float32),
        "m1": jnp.zeros((1, HID), jnp.float32),
        "v1": jnp.ones((1, HID), jnp.float32),
        # Linear(64, 3)
        "w2": u(ks[3], (HID, NCLS), HID),
        "b2": u(ks[4], (1, NCLS), HID),
        # BatchNorm1d(3)
        "g2": jnp.ones((1, NCLS), jnp.float32),
        "beta2": jnp.zeros((1, NCLS), jnp.float32),
        "m2": jnp.zeros((1, NCLS), jnp.float32),
        "v2": jnp.ones((1, NCLS), jnp.float32),
    }


def reference_unfused_f32(inter_nf, inter_up, p):
    """Original (unfused, f32) eval-mode math — checks the algebraic folding."""
    x = jnp.concatenate([inter_nf, inter_up], axis=1)
    h0 = x @ p["w_enc"]
    h1 = h0 @ p["w1"] + p["b1"]
    h1 = (h1 - p["m1"]) / jnp.sqrt(p["v1"] + BN_EPS) * p["g1"] + p["beta1"]
    h1 = jnp.maximum(h1, 0.0)
    h2 = h1 @ p["w2"] + p["b2"]
    h2 = (h2 - p["m2"]) / jnp.sqrt(p["v2"] + BN_EPS) * p["g2"] + p["beta2"]
    return h2


def reference_fused(inter_nf, inter_up, fused):
    """Same fused params as the kernel (bf16 weights, f32 math) — tight check."""
    xn = inter_nf.astype(jnp.bfloat16).astype(jnp.float32)
    xu = inter_up.astype(jnp.bfloat16).astype(jnp.float32)
    wt = fused["w_top"].astype(jnp.float32)
    wb = fused["w_bot"].astype(jnp.float32)
    b1 = fused["small"][0:1, :HID]
    w2 = fused["small"][8:8 + HID, :NCLS]
    b2 = fused["small"][8 + HID:9 + HID, :NCLS]
    h1 = jnp.maximum(xn @ wt + xu @ wb + b1, 0.0)
    return h1 @ w2 + b2


if __name__ == "__main__":
    key = jax.random.PRNGKey(0)
    k_in1, k_in2, k_p = jax.random.split(key, 3)

    inter_vect_no_forgetting = jax.random.normal(k_in1, (BATCH, EMB), jnp.float32)
    inter_vect_updated = jax.random.normal(k_in2, (BATCH, EMB), jnp.float32)

    params = init_params(k_p)
    fused = prepare_fused_params(params)

    logits = dti_3class_forward(inter_vect_no_forgetting, inter_vect_updated, fused)
    logits = jax.block_until_ready(logits)
    assert logits.shape == (BATCH, NCLS)

    # Tight check: identical fused params, f32 reference math.
    ref_tight = reference_fused(inter_vect_no_forgetting, inter_vect_updated, fused)
    assert jnp.allclose(logits, ref_tight, atol=2e-2, rtol=2e-2), \
        "kernel mismatch vs fused reference"

    # Loose check: original unfused f32 path (validates the offline BN/matmul fold;
    # tolerance covers bf16 weight/input rounding).
    ref_loose = reference_unfused_f32(inter_vect_no_forgetting, inter_vect_updated, params)
    assert jnp.allclose(logits, ref_loose, atol=6e-2, rtol=0), \
        "kernel mismatch vs unfused f32 reference"

    print("KERNEL_OK")
</pallas_src>

<mosaic_0001>
module attributes {stable_mosaic.version = 11 : i64} {
  func.func @dti_head_kernel(%arg0: memref<2x620xbf16, #tpu.memory_space<vmem>>, %arg1: memref<2x620xbf16, #tpu.memory_space<vmem>>, %arg2: memref<620x64xbf16, #tpu.memory_space<vmem>>, %arg3: memref<620x64xbf16, #tpu.memory_space<vmem>>, %arg4: memref<80x128xf32, #tpu.memory_space<vmem>>, %arg5: memref<2x3xf32, #tpu.memory_space<vmem>>) attributes {dimension_semantics = [], scalar_prefetch = 0 : i64, scratch_operands = 0 : i64, tpu.core_type = #tpu.core_type<tc>} {
    %c0 = arith.constant 0 : index
    %c0_0 = arith.constant 0 : index
    %0 = vector.load %arg0[%c0, %c0_0] : memref<2x620xbf16, #tpu.memory_space<vmem>>, vector<2x620xbf16>
    %c0_1 = arith.constant 0 : index
    %c0_2 = arith.constant 0 : index
    %1 = vector.load %arg2[%c0_1, %c0_2] : memref<620x64xbf16, #tpu.memory_space<vmem>>, vector<620x64xbf16>
    %cst = arith.constant dense<0.000000e+00> : vector<2x64xf32>
    %2 = tpu.matmul %0, %1, %cst {dimension_numbers = #tpu.dot_dimension_numbers<[1], [0], [0], [1], [0, 0, 1, 1], [], []>} : vector<2x620xbf16>, vector<620x64xbf16>, vector<2x64xf32> -> vector<2x64xf32>
    %c0_3 = arith.constant 0 : index
    %c0_4 = arith.constant 0 : index
    %3 = vector.load %arg1[%c0_3, %c0_4] : memref<2x620xbf16, #tpu.memory_space<vmem>>, vector<2x620xbf16>
    %c0_5 = arith.constant 0 : index
    %c0_6 = arith.constant 0 : index
    %4 = vector.load %arg3[%c0_5, %c0_6] : memref<620x64xbf16, #tpu.memory_space<vmem>>, vector<620x64xbf16>
    %cst_7 = arith.constant dense<0.000000e+00> : vector<2x64xf32>
    %5 = tpu.matmul %3, %4, %cst_7 {dimension_numbers = #tpu.dot_dimension_numbers<[1], [0], [0], [1], [0, 0, 1, 1], [], []>} : vector<2x620xbf16>, vector<620x64xbf16>, vector<2x64xf32> -> vector<2x64xf32>
    %6 = arith.addf %2, %5 : vector<2x64xf32>
    %c0_8 = arith.constant 0 : index
    %c0_9 = arith.constant 0 : index
    %7 = vector.load %arg4[%c0_8, %c0_9] : memref<80x128xf32, #tpu.memory_space<vmem>>, vector<1x64xf32>
    %8 = vector.broadcast %7 : vector<1x64xf32> to vector<2x64xf32>
    %9 = arith.addf %6, %8 : vector<2x64xf32>
    %cst_10 = arith.constant 0.000000e+00 : f32
    %10 = vector.broadcast %cst_10 : f32 to vector<2x64xf32>
    %11 = arith.maximumf %9, %10 : vector<2x64xf32>
    %c8 = arith.constant 8 : index
    %c0_11 = arith.constant 0 : index
    %12 = vector.load %arg4[%c8, %c0_11] : memref<80x128xf32, #tpu.memory_space<vmem>>, vector<64x3xf32>
    %c72 = arith.constant 72 : index
    %c0_12 = arith.constant 0 : index
    %13 = vector.load %arg4[%c72, %c0_12] : memref<80x128xf32, #tpu.memory_space<vmem>>, vector<1x3xf32>
    %cst_13 = arith.constant dense<0.000000e+00> : vector<2x3xf32>
    %14 = tpu.matmul %11, %12, %cst_13 {dimension_numbers = #tpu.dot_dimension_numbers<[1], [0], [0], [1], [0, 0, 1, 1], [], []>} : vector<2x64xf32>, vector<64x3xf32>, vector<2x3xf32> -> vector<2x3xf32>
    %15 = vector.broadcast %13 : vector<1x3xf32> to vector<2x3xf32>
    %16 = arith.addf %14, %15 : vector<2x3xf32>
    %c0_14 = arith.constant 0 : index
    %c0_15 = arith.constant 0 : index
    %17 = vector.load %arg5[%c0_14, %c0_15] : memref<2x3xf32, #tpu.memory_space<vmem>>, vector<2x3xf32>
    tpu.vector_store %arg5[%c0_14, %c0_15], %16 {strides = array<i32>} : memref<2x3xf32, #tpu.memory_space<vmem>>, vector<2x3xf32>,
    return
  }
}

</mosaic_0001>

<bundles_post_ra>
// kernel: tpu_custom_call.1
= control target key start
LH: loop header
LB: loop body
LE: loop exit
PB: predicated region body
PF: predicated region fallthrough
CT: control target
= control target key end

     0   :  { %v185_v30 = vlaneseq  ;;  %v1455_v33 = vmov 1966171168   ;;  %v1456_v36 = vmov 0.0   ;;  %vm461_vm0 = vcmask 1045504   ;;  %s1811_s0 = inlined_call_operand.vmem [shape: bf16[2,620], index: 0, kind: input, shape index: {}]   ;;  %s1812_s1 = inlined_call_operand.vmem [shape: bf16[2,620], index: 1, kind: input, shape index: {}]   ;;  %s1813_s2 = inlined_call_operand.vmem [shape: bf16[620,64], index: 2, kind: input, shape index: {}]   ;;  %s1814_s3 = inlined_call_operand.vmem [shape: bf16[620,64], index: 3, kind: input, shape index: {}]   ;;  %s1815_s4 = inlined_call_operand.vmem [shape: f32[80,128], index: 4, kind: input, shape index: {}]   ;;  %s1816_s5 = inlined_call_operand.hbm [shape: f32[2,3], index: 5, kind: output, shape index: {}]  }
   0x1   :  { %v1353_v0 = vld [vmem:[%s1814_s3 + $0x78] sm:$0xff]   ;;  %v1357_v4 = vld [vmem:[%s1814_s3 + $0x70] sm:$0xff]   ;;  %v1361_v8 = vld [vmem:[%s1814_s3 + $0x68] sm:$0xff]   ;;  %v183_v34 = vunpack.c.l.s4 %v1455_v33  ;;  %vm1457_vm1 = vmmov 0   ;;  %vm457_vm2 = vcmask 883712  }
   0x2   :  { %v1354_v1 = vld [vmem:[%s1814_s3 + $0xf8] sm:$0xff]   ;;  %1181 = vmatprep.subr.bf16.mxu0 %v1353_v0  ;;  %v1358_v5 = vld [vmem:[%s1814_s3 + $0xf0] sm:$0xff]   ;;  %v1362_v9 = vld [vmem:[%s1814_s3 + $0xe8] sm:$0xff]   ;;  %v186_v35 = vshrl.u32 %v185_v30, 7 }
   0x3   :  { %v1355_v2 = vld [vmem:[%s1814_s3 + $0x38] sm:$0xff]   ;;  %1203 = vmatprep.subr.bf16.mxu1 %v1354_v1  ;;  %v1359_v6 = vld [vmem:[%s1814_s3 + $0x30] sm:$0xff]   ;;  %v1363_v10 = vld [vmem:[%s1814_s3 + $0x28] sm:$0xff]   ;;  %v184_v38 = vunpack.c.0.s8 %v183_v34 }
   0x4   :  { %v1356_v3 = vld [vmem:[%s1814_s3 + $0xb8] sm:$0xff]   ;;  %1182 = vmatpush3.bf16.msra.mxu0 %v1355_v2  ;;  %v1360_v7 = vld [vmem:[%s1814_s3 + $0xb0] sm:$0xff]   ;;  %v1364_v11 = vld [vmem:[%s1814_s3 + $0xa8] sm:$0xff]  }
   0x5   :  { %1204 = vmatpush3.bf16.msra.mxu1 %v1356_v3  ;;  %1183 = vmatprep.subr.bf16.mxu0 %v1357_v4  ;;  %v1365_v12 = vld [vmem:[%s1814_s3 + $0x60] sm:$0xff]   ;;  %v1369_v16 = vld [vmem:[%s1814_s3 + $0x58] sm:$0xff]   ;;  %v1373_v20 = vld [vmem:[%s1814_s3 + $0x50] sm:$0xff]   ;;  %v1592_v40 = vsub.s32 %v184_v38, %v186_v35 }
   0x6   :  { %1205 = vmatprep.subr.bf16.mxu1 %v1358_v5  ;;  %v1366_v13 = vld [vmem:[%s1814_s3 + $0xe0] sm:$0xff]   ;;  %v1370_v17 = vld [vmem:[%s1814_s3 + $0xd8] sm:$0xff]   ;;  %v1374_v21 = vld [vmem:[%s1814_s3 + $0xd0] sm:$0xff]  }
   0x7   :  { %v1367_v14 = vld [vmem:[%s1814_s3 + $0x20] sm:$0xff]   ;;  %v1371_v18 = vld [vmem:[%s1814_s3 + $0x18] sm:$0xff]   ;;  %v1375_v22 = vld [vmem:[%s1814_s3 + $0x10] sm:$0xff]  }
   0x8   :  { %1184 = vmatpush3.bf16.msra.mxu0 %v1359_v6  ;;  %v1368_v15 = vld [vmem:[%s1814_s3 + $0xa0] sm:$0xff]   ;;  %v1372_v19 = vld [vmem:[%s1814_s3 + $0x98] sm:$0xff]   ;;  %v1376_v23 = vld [vmem:[%s1814_s3 + $0x90] sm:$0xff]  }
   0x9   :  { %1206 = vmatpush3.bf16.msra.mxu1 %v1360_v7  ;;  %1185 = vmatprep.subr.bf16.mxu0 %v1361_v8  ;;  %v1377_v24 = vld [vmem:[%s1814_s3 + $0x48] sm:$0xff]   ;;  %v1381_v28 = vld [vmem:[%s1814_s3 + $0x40] sm:$0xff]   ;;  %v1386_v37 = vld [vmem:[%s1813_s2 + $0x78] sm:$0xff]  }
   0xa   :  { %1207 = vmatprep.subr.bf16.mxu1 %v1362_v9  ;;  %v1378_v25 = vld [vmem:[%s1814_s3 + $0xc8] sm:$0xff]   ;;  %v1382_v29 = vld [vmem:[%s1814_s3 + $0xc0] sm:$0xff]   ;;  %v1387_v42 = vld [vmem:[%s1814_s3 + $0x130] sm:$0x3f]  }
   0xb   :  { %v1379_v26 = vld [vmem:[%s1814_s3 + $0x8] sm:$0xff]   ;;  %v1383_v31 = vld [vmem:[%s1814_s3] sm:$0xff]   ;;  %v463_v47 = vsel %vm461_vm0, %v1387_v42, 0  ;;  %v1388_v49 = vld [vmem:[%s1813_s2 + $0x38] sm:$0xff]  }
   0xc   :  { %1186 = vmatpush3.bf16.msra.mxu0 %v1363_v10  ;;  %v1380_v27 = vld [vmem:[%s1814_s3 + $0x88] sm:$0xff]   ;;  %v1384_v32 = vld [vmem:[%s1814_s3 + $0x80] sm:$0xff]   ;;  %v1389_v50 = vld [vmem:[%s1813_s2 + $0x70] sm:$0xff]  }
   0xd   :  { %1208 = vmatpush3.bf16.msra.mxu1 %v1364_v11  ;;  %1187 = vmatprep.subr.bf16.mxu0 %v1365_v12  ;;  %v101_v39 = vld [vmem:[%s1812_s1] sm:$0x1f]  ;;  %v1390_v51 = vld [vmem:[%s1814_s3 + $0x128] sm:$0xff]   ;;  %v1391_v52 = vld [vmem:[%s1813_s2 + $0x30] sm:$0xff]  }
   0xe   :  { %1209 = vmatprep.subr.bf16.mxu1 %v1366_v13  ;;  %v188_v41 = vrot.slane %v101_v39, %v1592_v40  ;;  %v1392_v53 = vld [vmem:[%s1813_s2 + $0x68] sm:$0xff]   ;;  %v1393_v54 = vld [vmem:[%s1814_s3 + $0x120] sm:$0xff]   ;;  %v1396_v57 = vld [vmem:[%s1814_s3 + $0x118] sm:$0xff]   ;;  %v181_v1 = vcombine.high %v101_v39, %v101_v39 }
   0xf   :  { %v1394_v55 = vld [vmem:[%s1813_s2 + $0x28] sm:$0xff]   ;;  %v1395_v56 = vld [vmem:[%s1813_s2 + $0x60] sm:$0xff]   ;;  %v1398_v60 = vld [vmem:[%s1813_s2 + $0x58] sm:$0xff]  }
  0x10   :  { %1188 = vmatpush3.bf16.msra.mxu0 %v1367_v14  ;;  %v196_v43 = vcombine.high %v188_v41, %v188_v41  ;;  %v203_v44 = vrot.slane %v188_v41, %v1592_v40  ;;  %v1397_v58 = vld [vmem:[%s1813_s2 + $0x20] sm:$0xff]   ;;  %v1399_v62 = vld [vmem:[%s1814_s3 + $0x110] sm:$0xff]   ;;  %v1400_v0 = vld [vmem:[%s1813_s2 + $0x18] sm:$0xff]   ;;  %v195_v6 = vrot.slane %v181_v1, %v1592_v40 }
  0x11   :  { %1210 = vmatpush3.bf16.msra.mxu1 %v1368_v15  ;;  %1189 = vmatprep.subr.bf16.mxu0 %v1369_v16  ;;  %v1639_v59 = vld [vmem:[%s1811_s0] sm:$0x1f]  ;;  %v1401_v2 = vld [vmem:[%s1813_s2 + $0x50] sm:$0xff]   ;;  %v1402_v4 = vld [vmem:[%s1814_s3 + $0x108] sm:$0xff]  }
  0x12   :  { %1211 = vmatprep.subr.bf16.mxu1 %v1370_v17  ;;  %v217_v45 = vrot.slane %v196_v43, %v1592_v40  ;;  %v218_v46 = vcombine.high %v203_v44, %v203_v44  ;;  %v593_v61 = vrot.slane %v1639_v59, %v1592_v40  ;;  %v1403_v5 = vld [vmem:[%s1813_s2 + $0x10] sm:$0xff]   ;;  %v1404_v7 = vld [vmem:[%s1813_s2 + $0x48] sm:$0xff]   ;;  %v1405_v8 = vld [vmem:[%s1814_s3 + $0x100] sm:$0xff]   ;;  %v210_v11 = vrot.slane %v195_v6, %v1592_v40 }
  0x13   :  { %v1408_v9 = vld [vmem:[%s1813_s2 + $0xf8] sm:$0xff]   ;;  %v1406_v10 = vld [vmem:[%s1813_s2 + $0x8] sm:$0xff]   ;;  %v1407_v12 = vld [vmem:[%s1813_s2 + $0x40] sm:$0xff]  }
  0x14   :  { %1190 = vmatpush3.bf16.msra.mxu0 %v1371_v18  ;;  %497 = vmatprep.mubr.bf16.mxu0 %v217_v45  ;;  %v219_v48 = vcombine.high %v217_v45, %v217_v45  ;;  %v601_v63 = vcombine.high %v593_v61, %v593_v61  ;;  %v1410_v13 = vld [vmem:[%s1813_s2 + $0xb8] sm:$0xff]   ;;  %v1412_v15 = vld [vmem:[%s1813_s2 + $0xf0] sm:$0xff]   ;;  %v1409_v16 = vld [vmem:[%s1813_s2] sm:$0xff]  }
  0x15   :  { %1212 = vmatpush3.bf16.msra.mxu1 %v1372_v19  ;;  %1191 = vmatprep.subr.bf16.mxu0 %v1373_v20  ;;  %v1414_v17 = vld [vmem:[%s1813_s2 + $0x130] sm:$0x3f]   ;;  %v608_v19 = vrot.slane %v593_v61, %v1592_v40  ;;  %v1415_v20 = vld [vmem:[%s1813_s2 + $0xe8] sm:$0xff]  }
  0x16   :  { %1213 = vmatprep.subr.bf16.mxu1 %v1374_v21  ;;  %537 = vmatprep.mubr.bf16.mxu1 %v219_v48  ;;  %v622_v3 = vrot.slane %v601_v63, %v1592_v40  ;;  %v1413_v18 = vld [vmem:[%s1813_s2 + $0xb0] sm:$0xff]   ;;  %v866_v21 = vsel %vm461_vm0, %v1414_v17, 0 }
  0x18   :  { %1192 = vmatpush3.bf16.msra.mxu0 %v1375_v22  ;;  %v624_v14 = vcombine.high %v622_v3, %v622_v3  ;;  %v1416_v22 = vld [vmem:[%s1813_s2 + $0xa8] sm:$0xff]  }
  0x19   :  { %1214 = vmatpush3.bf16.msra.mxu1 %v1376_v23  ;;  %1193 = vmatprep.subr.bf16.mxu0 %v1377_v24 }
  0x1a   :  { %1215 = vmatprep.subr.bf16.mxu1 %v1378_v25 }
  0x1c   :  { %1194 = vmatpush3.bf16.msra.mxu0 %v1379_v26 }
  0x1d   :  { %1216 = vmatpush3.bf16.msra.mxu1 %v1380_v27  ;;  %1195 = vmatprep.subr.bf16.mxu0 %v1381_v28 }
  0x1e   :  { %1217 = vmatprep.subr.bf16.mxu1 %v1382_v29 }
  0x20   :  { %1196 = vmatpush3.bf16.msra.mxu0 %v1383_v31 }
  0x21   :  { %1218 = vmatpush3.bf16.msra.mxu1 %v1384_v32  ;;  %1294 = vmatprep.subr.bf16.mxu0 %v1456_v36 }
  0x22   :  { %1233 = vmatprep.subr.bf16.mxu1 %v1386_v37 }
  0x23   :  { %498 = vmatmul.mubr.bf16.vlgmr.msra.gmra.mxu0 %v203_v44 }
  0x24   :  { %1295 = vmatpush3.bf16.msra.mxu0 %v463_v47  ;;  %538 = vmatmul.mubr.bf16.vlgmr.msra.gmra.mxu1 %v218_v46 }
  0x25   :  { %1296 = vmatprep.subr.bf16.mxu0 %v1456_v36  ;;  %1234 = vmatpush3.bf16.msra.mxu1 %v1388_v49 }
  0x26   :  { %1308 = vmatprep.mubr.msk.bf16.mxu0 %vm1457_vm1, %v1456_v36  ;;  %1235 = vmatprep.subr.bf16.mxu1 %v1389_v50 }
  0x27   :  { %900 = vmatprep.mubr.bf16.mxu1 %v622_v3 }
  0x28   :  { %1297 = vmatpush3.bf16.msra.mxu0 %v1390_v51 }
  0x29   :  { %1298 = vmatprep.subr.bf16.mxu0 %v1456_v36  ;;  %1236 = vmatpush3.bf16.msra.mxu1 %v1391_v52 }
  0x2a   :  { %1237 = vmatprep.subr.bf16.mxu1 %v1392_v53 }
  0x2c   :  { %1299 = vmatpush3.bf16.msra.mxu0 %v1393_v54 }
  0x2d   :  { %1300 = vmatprep.subr.bf16.mxu0 %v1456_v36  ;;  %1238 = vmatpush3.bf16.msra.mxu1 %v1394_v55 }
  0x2e   :  { %1239 = vmatprep.subr.bf16.mxu1 %v1395_v56 }
  0x30   :  { %1301 = vmatpush3.bf16.msra.mxu0 %v1396_v57 }
  0x31   :  { %1302 = vmatprep.subr.bf16.mxu0 %v1456_v36  ;;  %1240 = vmatpush3.bf16.msra.mxu1 %v1397_v58 }
  0x32   :  { %1241 = vmatprep.subr.bf16.mxu1 %v1398_v60 }
  0x34   :  { %1303 = vmatpush3.bf16.msra.mxu0 %v1399_v62 }
  0x35   :  { %1304 = vmatprep.subr.bf16.mxu0 %v1456_v36  ;;  %1242 = vmatpush3.bf16.msra.mxu1 %v1400_v0 }
  0x36   :  { %1243 = vmatprep.subr.bf16.mxu1 %v1401_v2 }
  0x38   :  { %1305 = vmatpush3.bf16.msra.mxu0 %v1402_v4 }
  0x39   :  { %1306 = vmatprep.subr.bf16.mxu0 %v1456_v36  ;;  %1244 = vmatpush3.bf16.msra.mxu1 %v1403_v5 }
  0x3a   :  { %1245 = vmatprep.subr.bf16.mxu1 %v1404_v7 }
  0x3c   :  { %1307 = vmatpush3.bf16.msra.mxu0 %v1405_v8 }
  0x3d   :  { %1255 = vmatprep.subr.bf16.mxu0 %v1408_v9  ;;  %1246 = vmatpush3.bf16.msra.mxu1 %v1406_v10 }
  0x3e   :  { %1247 = vmatprep.subr.bf16.mxu1 %v1407_v12 }
  0x3f   :  { %1309 = vmatmul.mubr.msk.bf16.vlgmr.msra.gmra.mxu0 %vm457_vm2, %v210_v11 }
  0x40   :  { %1256 = vmatpush3.bf16.msra.mxu0 %v1410_v13  ;;  %940 = vmatprep.mubr.bf16.mxu0 %v624_v14 }
  0x41   :  { %1257 = vmatprep.subr.bf16.mxu0 %v1412_v15  ;;  %1248 = vmatpush3.bf16.msra.mxu1 %v1409_v16 }
  0x42   :  { %1312 = vmatprep.subr.bf16.mxu1 %v1456_v36 }
  0x44   :  { %1258 = vmatpush3.bf16.msra.mxu0 %v1413_v18 }
  0x45   :  { %10 = vsyncpa [#allocation3], 0  ;;  %901 = vmatmul.mubr.bf16.vlgmr.msra.gmra.mxu1 %v608_v19  ;;  %1259 = vmatprep.subr.bf16.mxu0 %v1415_v20  ;;  %v1418_v23 = vld [vmem:[%s1813_s2 + $0xe0] sm:$0xff]   ;;  %v1417_v24 = vld [vmem:[%s1813_s2 + $0x128] sm:$0xff]   ;;  %v586_v35 = vcombine.high %v1639_v59, %v1639_v59  ;;  %v623_v43 = vcombine.high %v608_v19, %v608_v19  ;;  %vm1008_vm3 = vcmask 523264   ;;  %s1458_s12 = smov [#allocation2]  }
  0x46   :  { %1313 = vmatpush3.bf16.msra.mxu1 %v866_v21  ;;  %1326 = vmatprep.mubr.msk.bf16.mxu1 %vm1457_vm1, %v1456_v36  ;;  %v1419_v25 = vld [vmem:[%s1813_s2 + $0xa0] sm:$0xff]   ;;  %v1421_v26 = vld [vmem:[%s1813_s2 + $0xd8] sm:$0xff]   ;;  %v1424_v29 = vld [vmem:[%s1813_s2 + $0xd0] sm:$0xff]   ;;  %s1090_s1 = sshll.u32 %s1458_s12, 4  ;;  %vm1082_vm4 = vcmask 17408   ;;  %s1091_s1 = int_to_ptr.vmem [resolvable:$true] %s1090_s1 }
  0x47   :  { %1314 = vmatprep.subr.bf16.mxu1 %v1456_v36  ;;  %v1420_v27 = vld [vmem:[%s1813_s2 + $0x120] sm:$0xff]   ;;  %v1422_v28 = vld [vmem:[%s1813_s2 + $0x98] sm:$0xff]   ;;  %v1425_v31 = vld [vmem:[%s1813_s2 + $0x90] sm:$0xff]   ;;  %v600_v41 = vrot.slane %v586_v35, %v1592_v40  ;;  %s1433_s0 = scalar_lea.vmem %s1091_s1, 32  ;;  %p1438_p1 = scmp.lt.s32.totalorder %s1091_s1, %s1091_s1 }
  0x48   :  { %1260 = vmatpush3.bf16.msra.mxu0 %v1416_v22  ;;  %v1423_v30 = vld [vmem:[%s1813_s2 + $0x118] sm:$0xff]   ;;  %v1427_v32 = vld [vmem:[%s1813_s2 + $0xc8] sm:$0xff]   ;;  %v1426_v33 = vld [vmem:[%s1813_s2 + $0x110] sm:$0xff]   ;;  %p1434_p0 = scmp.ne.s32.totalorder %s1091_s1, %s1433_s0  ;;  %p1439_p2 = scmp.lt.s32.totalorder %s1433_s0, %s1433_s0 }
  0x49   :  { %1261 = vmatprep.subr.bf16.mxu0 %v1418_v23  ;;  %v1428_v34 = vld [vmem:[%s1813_s2 + $0x88] sm:$0xff]   ;;  %v1430_v37 = vld [vmem:[%s1813_s2 + $0xc0] sm:$0xff]   ;;  %v615_v44 = vrot.slane %v600_v41, %v1592_v40  ;;  %v1001_v40 = vld [vmem:[%s1815_s4 + $0x38] sm:$0xff] }
  0x4a   :  { %1315 = vmatpush3.bf16.msra.mxu1 %v1417_v24  ;;  %v1429_v38 = vld [vmem:[%s1813_s2 + $0x108] sm:$0xff]   ;;  %v1431_v39 = vld [vmem:[%s1813_s2 + $0x80] sm:$0xff]   ;;  %v1000_v46 = vld [vmem:[%s1815_s4 + $0x30] sm:$0xff]  ;;  %p1440_p3 = por %p1439_p2, %p1438_p1 }
  0x4b   :  { %1316 = vmatprep.subr.bf16.mxu1 %v1456_v36  ;;  %v1432_v42 = vld [vmem:[%s1813_s2 + $0x100] sm:$0xff]   ;;  %v999_v47 = vld [vmem:[%s1815_s4 + $0x28] sm:$0xff]  ;;  %v997_v49 = vld [vmem:[%s1815_s4 + $0x18] sm:$0xff] }
  0x4c   :  { %1262 = vmatpush3.bf16.msra.mxu0 %v1419_v25  ;;  %v1002_v45 = vld [vmem:[%s1815_s4 + $0x40] sm:$0xff]  ;;  %v996_v50 = vld [vmem:[%s1815_s4 + $0x10] sm:$0xff]  ;;  %v995_v51 = vld [vmem:[%s1815_s4 + $0x8] sm:$0xff]  ;;  %p1441_p4 = pnand %p1440_p3, %p1434_p0 }
  0x4d   :  { %1263 = vmatprep.subr.bf16.mxu0 %v1421_v26  ;;  %v998_v48 = vld [vmem:[%s1815_s4 + $0x20] sm:$0xff]  ;;  %v1179_v23 = vld [vmem:[%s1815_s4 + $0x48] ss:$0 sm:$0xff] }
  0x4e   :  { %1317 = vmatpush3.bf16.msra.mxu1 %v1420_v27  ;;  %v1178_v16 = vld [vmem:[%s1815_s4] ss:$0 sm:$0xff] }
  0x4f   :  { %1318 = vmatprep.subr.bf16.mxu1 %v1456_v36 }
  0x50   :  { %1264 = vmatpush3.bf16.msra.mxu0 %v1422_v28 }
  0x51   :  { %1265 = vmatprep.subr.bf16.mxu0 %v1424_v29 }
  0x52   :  { %1319 = vmatpush3.bf16.msra.mxu1 %v1423_v30 }
  0x53   :  { %1320 = vmatprep.subr.bf16.mxu1 %v1456_v36 }
  0x54   :  { %1266 = vmatpush3.bf16.msra.mxu0 %v1425_v31 }
  0x55   :  { %1267 = vmatprep.subr.bf16.mxu0 %v1427_v32 }
  0x56   :  { %1321 = vmatpush3.bf16.msra.mxu1 %v1426_v33 }
  0x57   :  { %1322 = vmatprep.subr.bf16.mxu1 %v1456_v36 }
  0x58   :  { %1268 = vmatpush3.bf16.msra.mxu0 %v1428_v34 }
  0x59   :  { %1269 = vmatprep.subr.bf16.mxu0 %v1430_v37 }
  0x5a   :  { %1323 = vmatpush3.bf16.msra.mxu1 %v1429_v38 }
  0x5b   :  { %1324 = vmatprep.subr.bf16.mxu1 %v1456_v36 }
  0x5c   :  { %1270 = vmatpush3.bf16.msra.mxu0 %v1431_v39 }
  0x5d   :  { %1330 = vmatprep.subr.mxu0 %v1456_v36 }
  0x5e   :  { %1325 = vmatpush3.bf16.msra.mxu1 %v1432_v42 }
  0x5f   :  { %941 = vmatmul.mubr.bf16.vlgmr.msra.gmra.mxu0 %v623_v43 }
  0x60   :  { %1346 = vmatprep.mubr.msk.f32.mxu0 %vm1457_vm1, %v1456_v36  ;;  %1331 = vmatpush3.msra.mxu0 %v1002_v45 }
  0x61   :  { %1327 = vmatmul.mubr.msk.bf16.vlgmr.msra.gmra.mxu1 %vm457_vm2, %v615_v44  ;;  %1332 = vmatprep.subr.mxu0 %v1456_v36 }
  0x62   :  { %1333 = vmatpush3.msra.mxu0 %v1001_v40 }
  0x63   :  { %1334 = vmatprep.subr.mxu0 %v1456_v36 }
  0x64   :  { %1335 = vmatpush3.msra.mxu0 %v1000_v46 }
  0x65   :  { %1336 = vmatprep.subr.mxu0 %v1456_v36 }
  0x66   :  { %1337 = vmatpush3.msra.mxu0 %v999_v47 }
  0x67   :  { %1338 = vmatprep.subr.mxu0 %v1456_v36 }
  0x68   :  { %1339 = vmatpush3.msra.mxu0 %v998_v48 }
  0x69   :  { %1340 = vmatprep.subr.mxu0 %v1456_v36 }
  0x6a   :  { %1341 = vmatpush3.msra.mxu0 %v997_v49 }
  0x6b   :  { %1342 = vmatprep.subr.mxu0 %v1456_v36 }
  0x6c   :  { %1343 = vmatpush3.msra.mxu0 %v996_v50 }
  0x6d   :  { %1344 = vmatprep.subr.mxu0 %v1456_v36 }
  0x6e   :  { %1345 = vmatpush3.msra.mxu0 %v995_v51 }
  0xe3   :  { %v1197_v52 = vpop.f32.mrf.mxu0 }
  0xe4   :  { %v1219_v53 = vpop.f32.mrf.mxu1 }
  0xe5   :  { %v1198_v54 = vpop.f32.mrf.mxu0 }
  0xe6   :  { %v1220_v55 = vpop.f32.mrf.mxu1  ;;  %v1199_v4 = vadd.f32 %v1198_v54, %v1197_v52 }
  0xe7   :  { %v1200_v56 = vpop.f32.mrf.mxu0  ;;  %v1221_v5 = vadd.f32 %v1220_v55, %v1219_v53 }
  0xe8   :  { %v1222_v57 = vpop.f32.mrf.mxu1 }
  0xe9   :  { %v1201_v58 = vpop.f32.mrf.mxu0  ;;  %v540_v36 = vadd.f32 %v1221_v5, %v1199_v4 }
  0xea   :  { %v1223_v59 = vpop.f32.mrf.mxu1 }
  0xff   :  { %v579_v60 = vpop.f32.mrf.mxu0 }
 0x100   :  { %v580_v8 = vadd.f32 %v579_v60, %v540_v36 }
 0x101   :  { %v1310_v61 = vpop.f32.mrf.mxu0 }
 0x103   :  { %v582_v62 = vpop.f32.mrf.mxu0 }
 0x105   :  { %v1249_v63 = vpop.f32.mrf.mxu1  ;;  %v1311_v0 = vpop.f32.mrf.mxu0 }
 0x107   :  { %v1250_v1 = vpop.f32.mrf.mxu1 }
 0x108   :  { %v1251_v6 = vadd.f32 %v1250_v1, %v1249_v63 }
 0x109   :  { %v1252_v2 = vpop.f32.mrf.mxu1 }
 0x10a   :  { %v903_v11 = vadd.f32 %v1251_v6, %v580_v8 }
 0x10b   :  { %v1253_v3 = vpop.f32.mrf.mxu1 }
 0x11f   :  { %v1271_v7 = vpop.f32.mrf.mxu0 }
 0x121   :  { %v982_v9 = vpop.f32.mrf.mxu1  ;;  %v1272_v10 = vpop.f32.mrf.mxu0 }
 0x122   :  { %v1273_v12 = vadd.f32 %v1272_v10, %v1271_v7 }
 0x123   :  { %v1328_v13 = vpop.f32.mrf.mxu1  ;;  %v1274_v14 = vpop.f32.mrf.mxu0 }
 0x124   :  { %v943_v15 = vadd.f32 %v1273_v12, %v903_v11 }
 0x125   :  { %v985_v17 = vpop.f32.mrf.mxu1  ;;  %v1275_v18 = vpop.f32.mrf.mxu0 }
 0x126   :  { %v983_v19 = vadd.f32 %v982_v9, %v943_v15 }
 0x127   :  { %v1329_v20 = vpop.f32.mrf.mxu1 }
 0x128   :  { %v993_v21 = vadd.f32 %v1178_v16, %v983_v19 }
 0x12a   :  { %v994_v22 = vmax.f32 %v993_v21, 0.0 }
 0x12c   :  { %1347 = vmatmul.mubr.msk.f32.vlgmr.msra.gmra.mxu0 %vm1008_vm3, %v994_v22 }
 0x1ec   :  { %v1078_v24 = vpop.f32.mrf.mxu0 }
 0x1ed   :  { %v1079_v25 = vadd.f32 %v1179_v23, %v1078_v24 }
 0x1ee   :  { %v1348_v26 = vpop.f32.mrf.mxu0 }
 0x1ef   :  { %1083 = vst.msk [vmem:[#allocation2] sm:$0x3] %vm1082_vm4, %v1079_v25 }
 0x1f0   :  { %1444 = shalt.err (!%p1441_p4)
}
 0x1f1   :  { %1093 = dma.vmem_to_hbm [thread:$0]  %s1091_s1, 32, %s1816_s5, [#allocation3]  }
 0x1f2   :  { %1453 = dma.done.wait [#allocation3], 32  }
 0x1f3   :  { %1454 = vsyncadd [#allocation3], 4294967264 }
 0x1f4   :  { %1097 = vsyncpa [#allocation3], 1 }

</bundles_post_ra>
